<compile_context>
chip_gen: v6e
topology: v6e:2x2x1
jax: 0.10.0
libtpu: 0.0.40
codegen_flags: <defaults>
</compile_context>

<pallas_src>
import jax
import jax.numpy as jnp
from jax import lax
from jax.experimental import pallas as pl
from jax.experimental.pallas import tpu as pltpu


def _embed_kernel(patches_ref, w_ref, pos_ref, out_ref):
    # patches_ref: (1, tm, K) bf16 patch vectors for one (batch, N-tile)
    # w_ref:       (K, E)     bf16 projection weight (resident across grid)
    # pos_ref:     (tm, E)    f32  position embedding with conv bias pre-folded
    # out_ref:     (1, tm, E) output tile in the model dtype
    acc = jnp.dot(patches_ref[0], w_ref[...],
                  preferred_element_type=jnp.float32)      # MXU, f32 accumulate
    out_ref[0] = (acc + pos_ref[...]).astype(out_ref.dtype)


def _choose_n_tile(n_patches: int, batch: int, max_rows: int = 512) -> int:
    """Largest multiple-of-8 divisor of N that is <= max_rows.

    Falls back to full N (always layout-legal).  If the whole grid would
    collapse to a single step, shrink so a second TensorCore (v7x) has work.
    """
    candidates = [t for t in range(8, min(n_patches, max_rows) + 1, 8)
                  if n_patches % t == 0]
    if not candidates:
        return n_patches
    tm = max(candidates)
    if batch * (n_patches // tm) < 2:
        halves = [t for t in candidates if n_patches // t >= 2]
        if halves:
            tm = max(halves)
    return tm


def prepare_siglip_embedding_params(conv_weight, conv_bias, pos_embedding,
                                    compute_dtype=jnp.bfloat16):
    """One-time weight prep, hoisted out of the per-call forward path.

    conv_weight  : (E, C, P, P)  nn.Conv2d weight (OIHW)
    conv_bias    : (E,)
    pos_embedding: (N, E)
    returns (w_k_e, pos_plus_bias):
      w_k_e        (K, E) compute-dtype weight, K ordered (c, ph, pw)
      pos_plus_bias(N, E) f32 position embedding with the conv bias folded in
    """
    E = conv_weight.shape[0]
    K = conv_weight.shape[1] * conv_weight.shape[2] * conv_weight.shape[3]
    w_k_e = conv_weight.reshape(E, K).T.astype(compute_dtype)          # (K, E)
    pos_plus_bias = (pos_embedding.astype(jnp.float32)
                     + conv_bias.astype(jnp.float32)[None, :])
    return w_k_e, pos_plus_bias


def siglip_vision_embeddings(pixel_values, w_k_e, pos_plus_bias, patch_size,
                             out_dtype=None):
    """
    pixel_values : (B, C, H, W) NCHW, same as the PyTorch module input
    w_k_e        : (K, E)       prepared projection weight (bf16), K = C*P*P
    pos_plus_bias: (N, E)       f32 position embedding + conv bias
    returns      : (B, N, E)    embeddings, N = (H/P)*(W/P)
    """
    B, C, H, W = pixel_values.shape
    P = patch_size
    K, E = w_k_e.shape
    Gh, Gw = H // P, W // P
    N = Gh * Gw
    assert K == C * P * P, (K, C, P)
    assert pos_plus_bias.shape == (N, E), pos_plus_bias.shape
    out_dtype = out_dtype or pixel_values.dtype
    compute_dtype = w_k_e.dtype

    # --- glue: cast to the compute dtype first (halves the rearrange traffic),
    # then extract non-overlapping patches in (c, ph, pw) order so the K axis
    # matches the OIHW -> (K, E) weight reshape.
    # TODO(synk): fuse this rearrange into the kernel (strip-block the NCHW
    # input and transpose in VMEM) to remove the extra HBM round-trip.
    x = pixel_values.astype(compute_dtype).reshape(B, C, Gh, P, Gw, P)
    patches = jnp.transpose(x, (0, 2, 4, 1, 3, 5)).reshape(B, N, K)

    tm = _choose_n_tile(N, B)
    grid = (B, N // tm)

    # VMEM budget: double-buffered patches / pos / out tiles + resident weight.
    in_itemsize = jnp.dtype(compute_dtype).itemsize
    out_itemsize = jnp.dtype(out_dtype).itemsize
    step_bytes = 2 * (tm * K * in_itemsize       # patches tile
                      + K * E * in_itemsize      # weight (resident)
                      + tm * E * 4               # pos+bias tile (f32)
                      + tm * E * out_itemsize)   # output tile
    vmem_limit = int(min(64 << 20, max(2 * step_bytes, 32 << 20)))

    return pl.pallas_call(
        _embed_kernel,
        out_shape=jax.ShapeDtypeStruct((B, N, E), out_dtype),
        grid_spec=pltpu.PrefetchScalarGridSpec(
            num_scalar_prefetch=0,
            grid=grid,
            in_specs=[
                pl.BlockSpec((1, tm, K), lambda b, n: (b, n, 0)),   # patches
                pl.BlockSpec((K, E), lambda b, n: (0, 0)),          # weight
                pl.BlockSpec((tm, E), lambda b, n: (n, 0)),         # pos+bias
            ],
            out_specs=pl.BlockSpec((1, tm, E), lambda b, n: (b, n, 0)),
        ),
        compiler_params=pltpu.CompilerParams(
            dimension_semantics=("parallel", "parallel"),
            vmem_limit_bytes=vmem_limit,
        ),
    )(patches, w_k_e, pos_plus_bias)


def _reference(pixel_values, conv_weight, conv_bias, pos_embedding,
               compute_dtype=jnp.float32):
    """Pure-JAX reference matching the PyTorch module semantics."""
    P = conv_weight.shape[-1]
    conv = lax.conv_general_dilated(
        pixel_values.astype(compute_dtype), conv_weight.astype(compute_dtype),
        window_strides=(P, P), padding="VALID",
        dimension_numbers=("NCHW", "OIHW", "NCHW"),
        preferred_element_type=jnp.float32,
    ) + conv_bias[None, :, None, None].astype(jnp.float32)
    B, E, Gh, Gw = conv.shape
    emb = conv.reshape(B, E, Gh * Gw).transpose(0, 2, 1)   # flatten(2).T(1,2)
    return (emb + pos_embedding[None].astype(jnp.float32)).astype(pixel_values.dtype)


if __name__ == "__main__":
    def run_case(B, C, H, W, P, E, seed):
        N = (H // P) * (W // P)
        key = jax.random.PRNGKey(seed)
        k1, k2, k3, k4 = jax.random.split(key, 4)
        pixel_values = jax.random.normal(k1, (B, C, H, W), dtype=jnp.float32)
        conv_weight = jax.random.normal(k2, (E, C, P, P), dtype=jnp.float32) * 0.02
        conv_bias = jax.random.normal(k3, (E,), dtype=jnp.float32) * 0.02
        pos_embedding = jax.random.normal(k4, (N, E), dtype=jnp.float32) * 0.02

        w_k_e, pos_plus_bias = prepare_siglip_embedding_params(
            conv_weight, conv_bias, pos_embedding)
        out = siglip_vision_embeddings(pixel_values, w_k_e, pos_plus_bias, P)
        out = jax.block_until_ready(out)
        assert out.shape == (B, N, E), out.shape

        ref_bf16 = _reference(pixel_values, conv_weight, conv_bias,
                              pos_embedding, compute_dtype=jnp.bfloat16)
        ref_f32 = _reference(pixel_values, conv_weight, conv_bias,
                             pos_embedding, compute_dtype=jnp.float32)
        assert jnp.allclose(out, ref_bf16, atol=5e-3, rtol=5e-3), \
            "mismatch vs bf16-operand reference"
        assert jnp.allclose(out, ref_f32, atol=2e-2, rtol=2e-2), \
            "mismatch vs f32 reference"

    # Small deterministic shapes. Case 1: B=2, single N-tile per batch.
    # Case 2: B=1 exercises sub-N tiling (two N tiles -> 2nd TC gets work on v7x).
    run_case(B=2, C=3, H=32, W=32, P=8, E=128, seed=0)
    run_case(B=1, C=3, H=32, W=32, P=8, E=128, seed=1)
    print("KERNEL_OK")
</pallas_src>

<mosaic_0001>
module attributes {stable_mosaic.version = 11 : i64} {
  func.func @_embed_kernel(%arg0: i32, %arg1: i32, %arg2: memref<1x16x192xbf16, #tpu.memory_space<vmem>>, %arg3: memref<192x128xbf16, #tpu.memory_space<vmem>>, %arg4: memref<16x128xf32, #tpu.memory_space<vmem>>, %arg5: memref<1x16x128xf32, #tpu.memory_space<vmem>>) attributes {dimension_semantics = [#tpu.dimension_semantics<parallel>, #tpu.dimension_semantics<parallel>], iteration_bounds = array<i64: 2, 1>, scalar_prefetch = 0 : i64, scratch_operands = 0 : i64, tpu.core_type = #tpu.core_type<tc>, window_params = [{transform_indices = @transform_0, window_bounds = array<i64: 1, 16, 192>}, {pipeline_mode = #tpu.pipeline_mode<synchronous>, transform_indices = @transform_1, window_bounds = array<i64: 192, 128>}, {transform_indices = @transform_2, window_bounds = array<i64: 16, 128>}, {transform_indices = @transform_3, window_bounds = array<i64: 1, 16, 128>}]} {
    %c0 = arith.constant 0 : index
    %c0_0 = arith.constant 0 : index
    %c0_1 = arith.constant 0 : index
    %0 = vector.load %arg2[%c0, %c0_0, %c0_1] : memref<1x16x192xbf16, #tpu.memory_space<vmem>>, vector<1x16x192xbf16>
    %1 = vector.shape_cast %0 : vector<1x16x192xbf16> to vector<16x192xbf16>
    %c0_2 = arith.constant 0 : index
    %c0_3 = arith.constant 0 : index
    %2 = vector.load %arg3[%c0_2, %c0_3] : memref<192x128xbf16, #tpu.memory_space<vmem>>, vector<192x128xbf16>
    %cst = arith.constant dense<0.000000e+00> : vector<16x128xf32>
    %3 = tpu.matmul %1, %2, %cst {dimension_numbers = #tpu.dot_dimension_numbers<[1], [0], [0], [1], [0, 0, 1, 1], [], []>} : vector<16x192xbf16>, vector<192x128xbf16>, vector<16x128xf32> -> vector<16x128xf32>
    %c0_4 = arith.constant 0 : index
    %c0_5 = arith.constant 0 : index
    %4 = vector.load %arg4[%c0_4, %c0_5] : memref<16x128xf32, #tpu.memory_space<vmem>>, vector<16x128xf32>
    %5 = arith.addf %3, %4 : vector<16x128xf32>
    %c0_6 = arith.constant 0 : index
    %c0_7 = arith.constant 0 : index
    %c0_8 = arith.constant 0 : index
    %6 = vector.load %arg5[%c0_6, %c0_7, %c0_8] : memref<1x16x128xf32, #tpu.memory_space<vmem>>, vector<1x16x128xf32>
    %7 = vector.shape_cast %6 : vector<1x16x128xf32> to vector<16x128xf32>
    %8 = vector.shape_cast %5 : vector<16x128xf32> to vector<1x16x128xf32>
    tpu.vector_store %arg5[%c0_6, %c0_7, %c0_8], %8 {strides = array<i32>} : memref<1x16x128xf32, #tpu.memory_space<vmem>>, vector<1x16x128xf32>,
    return
  }
  func.func @transform_0(%arg0: i32, %arg1: i32) -> (i32, i32, i32) {
    %c0_i32 = arith.constant 0 : i32
    %c0_i32_0 = arith.constant 0 : i32
    return %arg0, %arg1, %c0_i32 : i32, i32, i32
  }
  func.func @transform_1(%arg0: i32, %arg1: i32) -> (i32, i32) {
    %c0_i32 = arith.constant 0 : i32
    %c0_i32_0 = arith.constant 0 : i32
    %c0_i32_1 = arith.constant 0 : i32
    return %c0_i32, %c0_i32_0 : i32, i32
  }
  func.func @transform_2(%arg0: i32, %arg1: i32) -> (i32, i32) {
    %c0_i32 = arith.constant 0 : i32
    %c0_i32_0 = arith.constant 0 : i32
    return %arg1, %c0_i32 : i32, i32
  }
  func.func @transform_3(%arg0: i32, %arg1: i32) -> (i32, i32, i32) {
    %c0_i32 = arith.constant 0 : i32
    %c0_i32_0 = arith.constant 0 : i32
    return %arg0, %arg1, %c0_i32 : i32, i32, i32
  }
}

</mosaic_0001>

<bundles_post_ra>
// kernel: tpu_custom_call.1
= control target key start
LH: loop header
LB: loop body
LE: loop exit
PB: predicated region body
PF: predicated region fallthrough
CT: control target
= control target key end

     0   :  { %8 = vsyncpa [#allocation3], 0  ;;  %s1069_s0 = inlined_call_operand.hbm [shape: bf16[2,16,192], index: 0, kind: input, shape index: {}]   ;;  %s1070_s1 = inlined_call_operand.hbm [shape: bf16[192,128], index: 1, kind: input, shape index: {}]   ;;  %s1071_s2 = inlined_call_operand.hbm [shape: f32[16,128], index: 2, kind: input, shape index: {}]   ;;  %s1072_s3 = inlined_call_operand.hbm [shape: f32[2,16,128], index: 3, kind: output, shape index: {}]  }
   0x1   :  { %10 = vsyncpa [#allocation3 + $0x1], 0 }
   0x2   :  { %11 = vsyncpa [#allocation6], 0 }
   0x3   :  { %12 = vsyncpa [#allocation4], 0 }
   0x4   :  { %14 = vsyncpa [#allocation4 + $0x1], 0  ;;  %s867_s12 = smov 0   ;;  %s869_s13 = smov 0  }
   0x5   :  { %s871_s14 = smov 0   ;;  %s873_s15 = smov 0  }
   0x6   :  { %s875_s16 = smov 0   ;;  %s877_s17 = smov 0  }
   0x7 LB: > { %s529_s18 = sadd.s32 4294967295, %s834_s17   ;;  %s530_s19 = sadd.s32 4294967294, %s834_s17   ;;  %s834_s17 = sphi %s877_s17, %s20_s17   ;;  %s830_s16 = sphi %s875_s16, %s1094_s16   ;;  %s826_s15 = sphi %s873_s15, %s1093_s15   ;;  %s822_s14 = sphi %s871_s14, %s1092_s14   ;;  %s818_s13 = sphi %s869_s13, %s1091_s13   ;;  %s814_s12 = sphi %s867_s12, %s1090_s12  }
   0x8   : > { %p54_p0 = scmp.ne.s32.totalorder %s818_s13, %s814_s12  ;;  %p901_p1 = scmp.eq.s32.totalorder %s529_s18, 0 }
   0x9   : > { %p905_p2 = scmp.eq.s32.totalorder %s529_s18, 1  ;;  %p133_p3 = scmp.eq.s32.totalorder %s530_s19, 1 }
   0xa   : > { %s1077_s20 = scalar_select %p901_p1, 1, 0 }
   0xb   : > { %p911_p4 = por %p901_p1, %p54_p0  ;;  %p531_p5 = scmp.ge.s32.totalorder %s834_s17, 1 }
   0xc   : > { %p916_p6 = por %p133_p3, %p54_p0  ;;  %p140_p7 = scmp.lt.s32.totalorder %s834_s17, 3 }
   0xd   : > { %s1079_s22 = scalar_select %p911_p4, 1, 0 }
   0xe   : > { %s1080_s23 = scalar_select %p916_p6, 1, 0 }
   0xf   : > { %p921_p8 = pnand %p531_p5, %p140_p7  ;;  %s836_s25 = smov [#allocation5]  }
  0x10   : > { %s152_s26 = sshll.u32 %s836_s25, 4  ;;  %s837_s28 = smov [#allocation7]   ;;  %s153_s26 = int_to_ptr.vmem [resolvable:$true] %s152_s26 }
  0x11   : > { %p577_p9 = pneg %p921_p8  ;;  %s168_s29 = sshll.u32 %s837_s28, 4  ;;  %s169_s29 = int_to_ptr.vmem [resolvable:$true] %s168_s29 }
  0x12   : > { %s681_s30 = scalar_lea.vmem %s153_s26, 1536  ;;  %p689_p5 = scmp.lt.s32.totalorder %s153_s26, %s153_s26 }
  0x13   : > { %p930_p11 = pnand %p577_p9, %p901_p1  ;;  %p682_p13 = scmp.ne.s32.totalorder %s153_s26, %s681_s30 }
  0x14   : > { %p690_p7 = scmp.lt.s32.totalorder %s681_s30, %s681_s30 }
  0x15   : > { %p672_p12 = pneg %p930_p11 }
  0x16   : > { %p691_p10 = por %p690_p7, %p689_p5 }
  0x17   : > { %p684_p0 = pnand %p682_p13, %p672_p12 }
  0x19   : > { %p685_p3 = pneg %p684_p0 }
  0x1b   : > { %p692_p9 = pnand %p691_p10, %p685_p3 }
  0x1d   : > { %695 = shalt.err (!%p692_p9)
}
  0x1e   : > { %s838_s4 = smov 64   ;;  %s839_s5 = smov 4  }
  0x1f   : > { %580 = dma.hbm_to_vmem [thread:$0]  (!%p930_p11), %s1070_s1, 1536, %s153_s26, [#allocation6], %s838_s4, %s838_s4, %s839_s5  }
  0x20   : > { %s707_s8 = scalar_lea.vmem %s169_s29, 256  ;;  %p715_p1 = scmp.lt.s32.totalorder %s169_s29, %s169_s29 }
  0x21   : > { %p708_p6 = scmp.ne.s32.totalorder %s169_s29, %s707_s8  ;;  %p716_p4 = scmp.lt.s32.totalorder %s707_s8, %s707_s8 }
  0x23   : > { %p710_p13 = pnand %p708_p6, %p672_p12  ;;  %p717_p5 = por %p716_p4, %p715_p1 }
  0x25   : > { %p711_p0 = pneg %p710_p13 }
  0x27   : > { %p718_p10 = pnand %p717_p5, %p711_p0 }
  0x29   : > { %721 = shalt.err (!%p718_p10)
}
  0x2a   : > { %s1076_s9 = smov 128   ;;  %s841_s10 = smov 8  }
  0x2b   : > { %583 = dma.hbm_to_vmem [thread:$0]  (!%p930_p11), %s1071_s2, 256, %s169_s29, [#allocation6], %s1076_s9, %s1076_s9, %s841_s10  }
  0x2c   : > { %s32_s19 = sadd.s32 1, %s830_s16  ;;  %s41_s25 = sadd.s32 1, %s822_s14 }
  0x2d   : > { %p34_p1 = scmp.ge.s32.totalorder %s32_s19, 2  ;;  %p48_p4 = scmp.ne.s32.totalorder %s822_s14, %s818_s13 }
  0x2e   : > { %p49_p6 = scmp.eq.s32.totalorder %s834_s17, 0  ;;  %p594_p12 = scmp.lt.s32.totalorder %s834_s17, 2 }
  0x2f   : > { %s1096_s19 = smov (%p34_p1, %s32_s19), 0  ;;  %p965_p7 = por %p905_p2, %p48_p4 }
  0x30   : > { %p50_p3 = por %p49_p6, %p48_p4  ;;  %s36_s27 = ssub.s32 %s830_s16, %s1096_s19 }
  0x31   : > { %s182_s28 = sand.u32 1, %s822_s14   ;;  %p39_p9 = scmp.eq.s32.totalorder %s36_s27, 0 }
  0x32   : > { %s535_s29 = sshll.u32 %s182_s28, 4  ;;  %s563_s30 = sshll.u32 %s830_s16, 8 }
  0x33   : > { %s974_s4 = scalar_select %p39_p9, %s822_s14, %s41_s25  }
  0x34   : > { %s195_s7 = scalar_lea.hbm %s1069_s0, %s563_s30  ;;  %s186_s8 = scalar_lea.vmem [#allocation2], %s535_s29 }
  0x35   : > { %s196_s11 = sshll.u32 %s186_s8, 4  ;;  %p981_p11 = pnand %p594_p12, %p50_p3  ;;  %s197_s11 = int_to_ptr.vmem [resolvable:$true] %s196_s11 }
  0x36   : > { %s183_s18 = scalar_lea.sflag [#allocation3], %s182_s28  ;;  %s735_s27 = scalar_lea.vmem %s197_s11, 256 }
  0x37   : > { %p724_p2 = pneg %p981_p11  ;;  %p736_p13 = scmp.ne.s32.totalorder %s197_s11, %s735_s27 }
  0x38   : > { %s842_s25 = smov [#allocation2]  }
  0x39   : > { %p738_p0 = pnand %p736_p13, %p724_p2  ;;  %s740_s9 = sshll.u32 %s842_s25, 4  ;;  %s741_s9 = int_to_ptr.vmem [resolvable:$false] %s740_s9 }
  0x3a   : > { %s742_s30 = scalar_lea.vmem %s741_s9, 512  ;;  %p743_p10 = scmp.lt.s32.totalorder %s197_s11, %s741_s9 }
  0x3b   : > { %p739_p5 = pneg %p738_p0  ;;  %p744_p1 = scmp.lt.s32.totalorder %s742_s30, %s735_s27 }
  0x3d   : > { %p745_p4 = por %p744_p1, %p743_p10 }
  0x3f   : > { %p746_p6 = pnand %p745_p4, %p739_p5 }
  0x41   : > { %749 = shalt.err (!%p746_p6)
}
  0x42   : > { %s1085_s29 = smov 128   ;;  %208 = sbr.rel (%p921_p8) target bundleno = 337 (0x151), region = 32 }
  0x43   : > { %587 = dma.hbm_to_vmem [thread:$0]  (!%p981_p11), %s195_s7, 256, %s197_s11, %s183_s18, %s1085_s29, %s1085_s29, %s841_s10  }
  0x44   : > { %s995_s28 = sand.u32 (!%p921_p8), 1, %s818_s13   ;;  %p1086_p12 = scmp.ne.s32.totalorder (!%p921_p8), %s1079_s22, 0 }
  0x45   : > { %s539_s9 = sshll.u32 (!%p921_p8), %s995_s28, 4  ;;  %s211_s5 = scalar_lea.sflag (!%p921_p8), [#allocation3], %s995_s28 }
  0x46   : > { %s1001_s6 = scalar_lea.vmem (!%p921_p8), [#allocation2], %s539_s9 }
  0x47   : > { %801 = dma.done.wait (%p1086_p12), %s211_s5, 256  }
  0x48   : > { %803 = vsyncadd (%p1086_p12), %s211_s5, 4294967040  ;;  %p1087_p3 = scmp.ne.s32.totalorder %s1077_s20, 0 }
  0x4a   : > { %805 = dma.done.wait (%p1087_p3), [#allocation6], 1792  }
  0x4b   : > { %807 = vsyncadd (%p1087_p3), [#allocation6], 4294965504  ;;  %v843_v0 = vmov 0   ;;  %v655_v1 = vld [vmem:[#allocation5 + $0x38] sm:$0xff]   ;;  %v656_v2 = vld [vmem:[#allocation5 + $0x30] sm:$0xff]   ;;  %vm358_vm0 = vcmask 523264  }
  0x4c   : > { %362 = vmatprep.subr.bf16.mxu0 %v843_v0  ;;  %v657_v3 = vld [vmem:[#allocation5 + $0x28] sm:$0xff]   ;;  %v658_v4 = vld [vmem:[#allocation5 + $0x20] sm:$0xff]   ;;  %v659_v6 = vld [vmem:[#allocation5 + $0x18] sm:$0xff]   ;;  %s244_s20 = scalar_lea.vmem [#allocation8], %s539_s9  ;;  %s564_s24 = sshll.u32 %s826_s15, 8 }
  0x4d   : > { %363 = vmatpush1.bf16.msra.mxu0 %v655_v1  ;;  %v669_v5 = vld [vmem:[%s1001_s6 + $0x4] ss:$8 sps:$4 sm:$0xff]   ;;  %v667_v14 = vld [vmem:[%s1001_s6] ss:$8 sps:$4 sm:$0xff]   ;;  %s421_s22 = sshll.u32 %s244_s20, 4  ;;  %s1021_s8 = scalar_lea.hbm %s1072_s3, %s564_s24  ;;  %s1016_s22 = int_to_ptr.vmem [resolvable:$true] %s421_s22 }
  0x4e   : > { %364 = vmatprep.subr.bf16.mxu0 %v843_v0  ;;  %557 = vmatprep.mubr.msk.bf16.mxu0 %vm358_vm0, %v669_v5  ;;  %v660_v7 = vld [vmem:[#allocation5 + $0x10] sm:$0xff]   ;;  %v661_v8 = vld [vmem:[#allocation5 + $0x8] sm:$0xff]   ;;  %v662_v9 = vld [vmem:[#allocation5] sm:$0xff]   ;;  %s406_s11 = scalar_lea.sflag [#allocation4], %s995_s28  ;;  %s750_s21 = scalar_lea.vmem %s1016_s22, 256 }
  0x4f   : > { %v663_v10 = vld [vmem:[#allocation5 + $0x58] sm:$0xff]   ;;  %v664_v11 = vld [vmem:[#allocation5 + $0x50] sm:$0xff]   ;;  %v665_v12 = vld [vmem:[#allocation5 + $0x48] sm:$0xff]   ;;  %p751_p8 = scmp.ne.s32.totalorder %s1016_s22, %s750_s21  ;;  %s844_s15 = smov [#allocation8]  }
  0x50   : > { %v666_v13 = vld [vmem:[#allocation5 + $0x40] sm:$0xff]   ;;  %v276_v19 = vld [vmem:[#allocation7 + $0x8] sm:$0xff]  ;;  %s754_s18 = sshll.u32 %s844_s15, 4  ;;  %s755_s18 = int_to_ptr.vmem [resolvable:$false] %s754_s18 }
  0x51   : > { %365 = vmatpush1.bf16.msra.mxu0 %v656_v2  ;;  %v275_v15 = vld [vmem:[#allocation7] sm:$0xff]  ;;  %p752_p9 = pnand %p751_p8, %p965_p7  ;;  %s756_s27 = scalar_lea.vmem %s755_s18, 512 }
  0x52   : > { %366 = vmatprep.subr.bf16.mxu0 %v843_v0  ;;  %p757_p2 = scmp.lt.s32.totalorder %s1016_s22, %s755_s18  ;;  %p758_p13 = scmp.lt.s32.totalorder %s756_s27, %s750_s21 }
  0x53   : > { %p753_p11 = pneg %p752_p9 }
  0x54   : > { %p759_p0 = por %p758_p13, %p757_p2 }
  0x55   : > { %367 = vmatpush1.bf16.msra.mxu0 %v657_v3 }
  0x56   : > { %368 = vmatprep.subr.bf16.mxu0 %v843_v0  ;;  %p760_p5 = pnand %p759_p0, %p753_p11 }
  0x59   : > { %369 = vmatpush1.bf16.msra.mxu0 %v658_v4 }
  0x5a   : > { %370 = vmatprep.subr.bf16.mxu0 %v843_v0 }
  0x5d   : > { %371 = vmatpush1.bf16.msra.mxu0 %v659_v6 }
  0x5e   : > { %372 = vmatprep.subr.bf16.mxu0 %v843_v0 }
  0x61   : > { %373 = vmatpush1.bf16.msra.mxu0 %v660_v7 }
  0x62   : > { %374 = vmatprep.subr.bf16.mxu0 %v843_v0 }
  0x65   : > { %375 = vmatpush1.bf16.msra.mxu0 %v661_v8 }
  0x66   : > { %376 = vmatprep.subr.bf16.mxu0 %v843_v0 }
  0x69   : > { %377 = vmatpush1.bf16.msra.mxu0 %v662_v9 }
  0x6a   : > { %386 = vmatprep.subr.bf16.mxu0 %v843_v0 }
  0x6d   : > { %387 = vmatpush2.bf16.msra.mxu0 %v663_v10 }
  0x6e   : > { %388 = vmatprep.subr.bf16.mxu0 %v843_v0 }
  0x71   : > { %389 = vmatpush2.bf16.msra.mxu0 %v664_v11 }
  0x72   : > { %390 = vmatprep.subr.bf16.mxu0 %v843_v0 }
  0x75   : > { %391 = vmatpush2.bf16.msra.mxu0 %v665_v12 }
  0x76   : > { %392 = vmatprep.subr.bf16.mxu0 %v843_v0 }
  0x79   : > { %393 = vmatpush2.bf16.msra.mxu0 %v666_v13 }
  0x7c   : > { %395 = vmatmul.mubr.bf16.vlgmr.msra.gmra.mxu0 %v667_v14 }
 0x13c   : > { %v396_v16 = vpop.f32.mrf.mxu0 }
 0x13d   : > { %v397_v17 = vadd.f32 %v396_v16, %v275_v15 }
 0x13e   : > { %v398_v18 = vpop.f32.mrf.mxu0 }
 0x13f   : > { %403 = vst [vmem:[%s244_s20] sm:$0xff] %v397_v17 }
 0x140   : > { %v399_v20 = vpop.f32.mrf.mxu0 }
 0x141   : > { %v400_v21 = vadd.f32 %v399_v20, %v276_v19 }
 0x142   : > { %v401_v22 = vpop.f32.mrf.mxu0 }
 0x143   : > { %404 = vst [vmem:[%s244_s20 + $0x8] sm:$0xff] %v400_v21 }
 0x144   : > { %763 = shalt.err (!%p760_p5)
}
 0x145   : > { %s764_s25 = scalar_lea.hbm %s1021_s8, 256  ;;  %s768_s9 = scalar_lea.hbm %s1072_s3, 512 }
 0x146   : > { %p765_p10 = scmp.ne.s32.totalorder %s1021_s8, %s764_s25  ;;  %p769_p6 = scmp.lt.s32.totalorder %s1021_s8, %s1072_s3 }
 0x147   : > { %p770_p12 = scmp.lt.s32.totalorder %s768_s9, %s764_s25 }
 0x148   : > { %p766_p1 = pnand %p765_p10, %p965_p7 }
 0x149   : > { %p771_p3 = por %p770_p12, %p769_p6 }
 0x14a   : > { %p767_p4 = pneg %p766_p1 }
 0x14c   : > { %p772_p8 = pnand %p771_p3, %p767_p4 }
 0x14e   : > { %775 = shalt.err (!%p772_p8)
}
 0x14f   : > { %s845_s20 = smov 128   ;;  %s846_s24 = smov 8  }
 0x150   : > { %575 = dma.vmem_to_hbm [thread:$0]  (%p965_p7), %s1016_s22, 256, %s1021_s8, %s406_s11, %s845_s20, %s845_s20, %s846_s24  }
 0x151 PF: > { %s436_s10 = sand.u32 1, %s814_s12   ;;  %p1088_p9 = scmp.ne.s32.totalorder %s1080_s23, 0 }
 0x152   : > { %p1089_p11 = scmp.ge.s32.totalorder %s834_s17, 2  ;;  %s437_s7 = scalar_lea.sflag [#allocation4], %s436_s10 }
 0x154   : > { %p589_p2 = pnand %p1089_p11, %p1088_p9 }
 0x156   : > { %p590_p13 = pneg %p589_p2 }
 0x158   : > { %809 = dma.done.wait (%p590_p13), %s437_s7, 256  }
 0x159   : > { %811 = vsyncadd (%p590_p13), %s437_s7, 4294967040  ;;  %s20_s17 = sadd.s32 1, %s834_s17   ;;  %s1090_s12 = smov %s818_s13 }
 0x15a   : > { %p17_p0 = scmp.ge.s32.totalorder %s20_s17, 4   ;;  %s1091_s13 = smov %s822_s14 }
 0x15b   : > { %s1092_s14 = smov %s974_s4  ;;  %s1093_s15 = smov %s830_s16 }
 0x15c   : > { %s1094_s16 = smov %s1096_s19  ;;  %19 = sbr.rel (!%p17_p0) target bundleno = 7 (0x7), region = 86 }
 0x161   :  { %442 = vsyncpa [#allocation3], 1 }
 0x162   :  { %444 = vsyncpa [#allocation3 + $0x1], 1 }
 0x163   :  { %445 = vsyncpa [#allocation6], 1 }
 0x164   :  { %446 = vsyncpa [#allocation4], 1 }
 0x165   :  { %448 = vsyncpa [#allocation4 + $0x1], 1 }

</bundles_post_ra>
